<compile_context>
chip_gen: v6e
topology: v6e:2x2x1
jax: 0.10.0
libtpu: 0.0.40
codegen_flags: <defaults>
</compile_context>

<pallas_src>
import functools

import jax
import jax.numpy as jnp
from jax.experimental import pallas as pl
from jax.experimental.pallas import tpu as pltpu

PAD_H = 128  # hidden width padded to one full lane width


def _round_up(x, m):
    return (x + m - 1) // m * m


# --------------------------------------------------------------------------- #
# Kernel
# --------------------------------------------------------------------------- #
def _second_order_kernel(num_mid, state_dim, out_keep,
                         row_b_in, mid_base, mid_stride, out_base,
                         t_ref, z_ref, p_ref, out_ref):
    n = z_ref.shape[0] // 2
    z = z_ref[...]                         # (2N, D) -> vregs
    y = z[:n]                              # (N, D)
    v = z[n:]                              # (N, D)
    t = t_ref[0]                           # scalar time from SMEM

    # ---- first layer: tiny K = 1 + 2*D -> VPU broadcast FMAs (skip the MXU) --
    acc = p_ref[pl.ds(row_b_in, 1), :] + t * p_ref[pl.ds(0, 1), :]   # (1, 128)
    for j in range(state_dim):
        acc = acc + y[:, j:j + 1] * p_ref[pl.ds(1 + j, 1), :]
        acc = acc + v[:, j:j + 1] * p_ref[pl.ds(1 + state_dim + j, 1), :]
    h = jnp.tanh(acc)                                                # (N, 128)

    # ---- hidden layers: full 128x128 MXU matmuls + tanh ----------------------
    for l in range(num_mid):
        base = mid_base + l * mid_stride
        w = p_ref[pl.ds(base, PAD_H), :]                             # (128, 128)
        b = p_ref[pl.ds(base + PAD_H, 1), :]                         # (1, 128)
        h = jnp.tanh(jnp.dot(h, w, preferred_element_type=jnp.float32) + b)

    # ---- output layer: lane-padded to 128 cols (only out_keep are real) ------
    w = p_ref[pl.ds(out_base, PAD_H), :]
    b = p_ref[pl.ds(out_base + PAD_H, 1), :]
    o = jnp.dot(h, w, preferred_element_type=jnp.float32) + b        # (N, 128)

    # ---- fused final concat: [v ; out[:, :input_dim-1]] along batch ----------
    out_ref[0:n, :] = v.astype(out_ref.dtype)
    out_ref[n:, :] = o[:, :out_keep].astype(out_ref.dtype)


# --------------------------------------------------------------------------- #
# Wrapper
# --------------------------------------------------------------------------- #
def second_order_forward(t, z, packed_params, *, num_mid, state_dim, first_in):
    """Pallas implementation of SecondOrderAugmentedODEFunc.forward(t, z)."""
    two_n, d = z.shape
    assert d == state_dim

    sec0 = _round_up(first_in + 1, 8)         # first-layer section rows
    stride = _round_up(PAD_H + 1, 8)          # per-hidden/output section rows
    kernel = functools.partial(
        _second_order_kernel, num_mid, state_dim, state_dim,
        first_in,                             # row of b_in
        sec0,                                 # first hidden-layer base row
        stride,                               # section stride
        sec0 + num_mid * stride)              # output-layer base row

    t_arr = jnp.full((1,), t, jnp.float32)
    vmem = pl.BlockSpec(memory_space=pltpu.MemorySpace.VMEM)
    smem = pl.BlockSpec(memory_space=pltpu.MemorySpace.SMEM)

    return pl.pallas_call(
        kernel,
        out_shape=jax.ShapeDtypeStruct((two_n, d), jnp.float32),
        in_specs=[smem, vmem, vmem],
        out_specs=vmem,
    )(t_arr, z, packed_params)


# --------------------------------------------------------------------------- #
# Parameter construction
# --------------------------------------------------------------------------- #
def init_raw_params(key, first_in, hidden_dim, num_mid, out_dim):
    """PyTorch-Linear-style init; weights stored pre-transposed as (in, out)."""
    keys = jax.random.split(key, 6)

    def unif(k, shape, fan_in):
        bound = 1.0 / jnp.sqrt(jnp.float32(fan_in))
        return jax.random.uniform(k, shape, jnp.float32, -bound, bound)

    w1 = unif(keys[0], (first_in, hidden_dim), first_in)
    b1 = unif(keys[1], (hidden_dim,), first_in)
    wm = unif(keys[2], (num_mid, hidden_dim, hidden_dim), hidden_dim)
    bm = unif(keys[3], (num_mid, hidden_dim), hidden_dim)
    wo = unif(keys[4], (hidden_dim, out_dim), hidden_dim)
    bo = unif(keys[5], (out_dim,), hidden_dim)
    return (w1, b1, wm, bm, wo, bo)


def pack_params(raw, hidden_dim, num_mid, first_in, out_dim):
    """Pack all layers into ONE zero-padded (rows, 128) f32 buffer.

    Layout (each section starts on an 8-row boundary):
      rows [0, first_in)              : W1   (first_in, H) zero-padded to 128 cols
      row  first_in                   : b1
      per hidden layer l (stride 136) : W_l (128 rows), b_l at row base+128
      output section                  : W_out (128 rows), b_out at row base+128
    """
    w1, b1, wm, bm, wo, bo = raw
    sec0 = _round_up(first_in + 1, 8)
    stride = _round_up(PAD_H + 1, 8)
    total = sec0 + (num_mid + 1) * stride

    buf = jnp.zeros((total, PAD_H), jnp.float32)
    buf = buf.at[0:first_in, 0:hidden_dim].set(w1)
    buf = buf.at[first_in, 0:hidden_dim].set(b1)
    for l in range(num_mid):
        base = sec0 + l * stride
        buf = buf.at[base:base + hidden_dim, 0:hidden_dim].set(wm[l])
        buf = buf.at[base + PAD_H, 0:hidden_dim].set(bm[l])
    base = sec0 + num_mid * stride
    buf = buf.at[base:base + hidden_dim, 0:out_dim].set(wo)
    buf = buf.at[base + PAD_H, 0:out_dim].set(bo)
    return buf


# --------------------------------------------------------------------------- #
# Pure-JAX reference (unpadded) for correctness checking
# --------------------------------------------------------------------------- #
def reference_forward(t, z, raw, *, input_dim):
    w1, b1, wm, bm, wo, bo = raw
    n = z.shape[0] // 2
    y, v = z[:n], z[n:]
    x = jnp.concatenate([jnp.full((n, 1), t, z.dtype), y, v], axis=1)
    hp = jax.lax.Precision.HIGHEST
    h = jnp.tanh(jnp.dot(x, w1, precision=hp) + b1)
    for l in range(wm.shape[0]):
        h = jnp.tanh(jnp.dot(h, wm[l], precision=hp) + bm[l])
    out = jnp.dot(h, wo, precision=hp) + bo
    return jnp.concatenate([v, out[:, :input_dim - 1]], axis=0)


# --------------------------------------------------------------------------- #
if __name__ == "__main__":
    # Small shapes consistent with Exa5_3dim: 3-dim data, no augmentation.
    input_dim = 3
    augment_dim = 0
    hidden_dim = 32
    num_layers = 3            # 1 input layer, 2 hidden tanh layers, 1 output layer
    batch = 8                 # N trajectories -> z has 2N rows (positions ; velocities)

    state_dim = input_dim - 1            # feature dim of y and v (see TODO above)
    first_in = 1 + 2 * state_dim         # t + y + v
    out_dim = input_dim + augment_dim    # net output width
    num_mid = num_layers - 1

    key = jax.random.PRNGKey(0)
    k_params, k_z = jax.random.split(key)
    raw = init_raw_params(k_params, first_in, hidden_dim, num_mid, out_dim)
    packed = pack_params(raw, hidden_dim, num_mid, first_in, out_dim)

    z = jax.random.normal(k_z, (2 * batch, state_dim), jnp.float32)
    t = jnp.float32(0.7)

    out = second_order_forward(t, z, packed,
                               num_mid=num_mid,
                               state_dim=state_dim,
                               first_in=first_in)
    out = jax.block_until_ready(out)

    ref = reference_forward(t, z, raw, input_dim=input_dim)
    assert out.shape == (2 * batch, state_dim)
    assert jnp.allclose(out, ref, atol=1e-4, rtol=1e-4), (
        f"mismatch vs reference, max err {jnp.max(jnp.abs(out - ref))}")

    print("KERNEL_OK")
</pallas_src>

<mosaic_0001>
module attributes {stable_mosaic.version = 11 : i64} {
  func.func @_second_order_kernel(%arg0: memref<1xf32, #tpu.memory_space<smem>>, %arg1: memref<16x2xf32, #tpu.memory_space<vmem>>, %arg2: memref<416x128xf32, #tpu.memory_space<vmem>>, %arg3: memref<16x2xf32, #tpu.memory_space<vmem>>) attributes {dimension_semantics = [], scalar_prefetch = 0 : i64, scratch_operands = 0 : i64, tpu.core_type = #tpu.core_type<tc>} {
    %c0 = arith.constant 0 : index
    %c0_0 = arith.constant 0 : index
    %0 = vector.load %arg1[%c0, %c0_0] : memref<16x2xf32, #tpu.memory_space<vmem>>, vector<16x2xf32>
    %1 = vector.extract_strided_slice %0 {offsets = [0, 0], sizes = [8, 2], strides = [1, 1]} : vector<16x2xf32> to vector<8x2xf32>
    %2 = vector.extract_strided_slice %0 {offsets = [8, 0], sizes = [8, 2], strides = [1, 1]} : vector<16x2xf32> to vector<8x2xf32>
    %c0_1 = arith.constant 0 : index
    %3 = memref.load %arg0[%c0_1] : memref<1xf32, #tpu.memory_space<smem>>
    %c5 = arith.constant 5 : index
    %c0_2 = arith.constant 0 : index
    %4 = vector.load %arg2[%c5, %c0_2] : memref<416x128xf32, #tpu.memory_space<vmem>>, vector<1x128xf32>
    %c0_3 = arith.constant 0 : index
    %c0_4 = arith.constant 0 : index
    %5 = vector.load %arg2[%c0_3, %c0_4] : memref<416x128xf32, #tpu.memory_space<vmem>>, vector<1x128xf32>
    %6 = vector.broadcast %3 : f32 to vector<1x128xf32>
    %7 = arith.mulf %6, %5 : vector<1x128xf32>
    %8 = arith.addf %4, %7 : vector<1x128xf32>
    %9 = vector.extract_strided_slice %1 {offsets = [0, 0], sizes = [8, 1], strides = [1, 1]} : vector<8x2xf32> to vector<8x1xf32>
    %c1 = arith.constant 1 : index
    %c0_5 = arith.constant 0 : index
    %10 = vector.load %arg2[%c1, %c0_5] : memref<416x128xf32, #tpu.memory_space<vmem>>, vector<1x128xf32>
    %11 = vector.broadcast %9 : vector<8x1xf32> to vector<8x128xf32>
    %12 = vector.broadcast %10 : vector<1x128xf32> to vector<8x128xf32>
    %13 = arith.mulf %11, %12 : vector<8x128xf32>
    %14 = vector.broadcast %8 : vector<1x128xf32> to vector<8x128xf32>
    %15 = arith.addf %14, %13 : vector<8x128xf32>
    %16 = vector.extract_strided_slice %2 {offsets = [0, 0], sizes = [8, 1], strides = [1, 1]} : vector<8x2xf32> to vector<8x1xf32>
    %c3 = arith.constant 3 : index
    %c0_6 = arith.constant 0 : index
    %17 = vector.load %arg2[%c3, %c0_6] : memref<416x128xf32, #tpu.memory_space<vmem>>, vector<1x128xf32>
    %18 = vector.broadcast %16 : vector<8x1xf32> to vector<8x128xf32>
    %19 = vector.broadcast %17 : vector<1x128xf32> to vector<8x128xf32>
    %20 = arith.mulf %18, %19 : vector<8x128xf32>
    %21 = arith.addf %15, %20 : vector<8x128xf32>
    %22 = vector.extract_strided_slice %1 {offsets = [0, 1], sizes = [8, 1], strides = [1, 1]} : vector<8x2xf32> to vector<8x1xf32>
    %c2 = arith.constant 2 : index
    %c0_7 = arith.constant 0 : index
    %23 = vector.load %arg2[%c2, %c0_7] : memref<416x128xf32, #tpu.memory_space<vmem>>, vector<1x128xf32>
    %24 = vector.broadcast %22 : vector<8x1xf32> to vector<8x128xf32>
    %25 = vector.broadcast %23 : vector<1x128xf32> to vector<8x128xf32>
    %26 = arith.mulf %24, %25 : vector<8x128xf32>
    %27 = arith.addf %21, %26 : vector<8x128xf32>
    %28 = vector.extract_strided_slice %2 {offsets = [0, 1], sizes = [8, 1], strides = [1, 1]} : vector<8x2xf32> to vector<8x1xf32>
    %c4 = arith.constant 4 : index
    %c0_8 = arith.constant 0 : index
    %29 = vector.load %arg2[%c4, %c0_8] : memref<416x128xf32, #tpu.memory_space<vmem>>, vector<1x128xf32>
    %30 = vector.broadcast %28 : vector<8x1xf32> to vector<8x128xf32>
    %31 = vector.broadcast %29 : vector<1x128xf32> to vector<8x128xf32>
    %32 = arith.mulf %30, %31 : vector<8x128xf32>
    %33 = arith.addf %27, %32 : vector<8x128xf32>
    %34 = math.tanh %33 : vector<8x128xf32>
    %c8 = arith.constant 8 : index
    %c0_9 = arith.constant 0 : index
    %35 = vector.load %arg2[%c8, %c0_9] : memref<416x128xf32, #tpu.memory_space<vmem>>, vector<128x128xf32>
    %c136 = arith.constant 136 : index
    %c0_10 = arith.constant 0 : index
    %36 = vector.load %arg2[%c136, %c0_10] : memref<416x128xf32, #tpu.memory_space<vmem>>, vector<1x128xf32>
    %cst = arith.constant dense<0.000000e+00> : vector<8x128xf32>
    %37 = tpu.matmul %34, %35, %cst {dimension_numbers = #tpu.dot_dimension_numbers<[1], [0], [0], [1], [0, 0, 1, 1], [], []>} : vector<8x128xf32>, vector<128x128xf32>, vector<8x128xf32> -> vector<8x128xf32>
    %38 = vector.broadcast %36 : vector<1x128xf32> to vector<8x128xf32>
    %39 = arith.addf %37, %38 : vector<8x128xf32>
    %40 = math.tanh %39 : vector<8x128xf32>
    %c144 = arith.constant 144 : index
    %c0_11 = arith.constant 0 : index
    %41 = vector.load %arg2[%c144, %c0_11] : memref<416x128xf32, #tpu.memory_space<vmem>>, vector<128x128xf32>
    %c272 = arith.constant 272 : index
    %c0_12 = arith.constant 0 : index
    %42 = vector.load %arg2[%c272, %c0_12] : memref<416x128xf32, #tpu.memory_space<vmem>>, vector<1x128xf32>
    %cst_13 = arith.constant dense<0.000000e+00> : vector<8x128xf32>
    %43 = tpu.matmul %40, %41, %cst_13 {dimension_numbers = #tpu.dot_dimension_numbers<[1], [0], [0], [1], [0, 0, 1, 1], [], []>} : vector<8x128xf32>, vector<128x128xf32>, vector<8x128xf32> -> vector<8x128xf32>
    %44 = vector.broadcast %42 : vector<1x128xf32> to vector<8x128xf32>
    %45 = arith.addf %43, %44 : vector<8x128xf32>
    %46 = math.tanh %45 : vector<8x128xf32>
    %c280 = arith.constant 280 : index
    %c0_14 = arith.constant 0 : index
    %47 = vector.load %arg2[%c280, %c0_14] : memref<416x128xf32, #tpu.memory_space<vmem>>, vector<128x128xf32>
    %c408 = arith.constant 408 : index
    %c0_15 = arith.constant 0 : index
    %48 = vector.load %arg2[%c408, %c0_15] : memref<416x128xf32, #tpu.memory_space<vmem>>, vector<1x128xf32>
    %cst_16 = arith.constant dense<0.000000e+00> : vector<8x128xf32>
    %49 = tpu.matmul %46, %47, %cst_16 {dimension_numbers = #tpu.dot_dimension_numbers<[1], [0], [0], [1], [0, 0, 1, 1], [], []>} : vector<8x128xf32>, vector<128x128xf32>, vector<8x128xf32> -> vector<8x128xf32>
    %50 = vector.broadcast %48 : vector<1x128xf32> to vector<8x128xf32>
    %51 = arith.addf %49, %50 : vector<8x128xf32>
    %c0_17 = arith.constant 0 : index
    %c0_18 = arith.constant 0 : index
    %52 = vector.load %arg3[%c0_17, %c0_18] : memref<16x2xf32, #tpu.memory_space<vmem>>, vector<8x2xf32>
    tpu.vector_store %arg3[%c0_17, %c0_18], %2 {strides = array<i32>} : memref<16x2xf32, #tpu.memory_space<vmem>>, vector<8x2xf32>,
    %53 = vector.extract_strided_slice %51 {offsets = [0, 0], sizes = [8, 2], strides = [1, 1]} : vector<8x128xf32> to vector<8x2xf32>
    %c8_19 = arith.constant 8 : index
    %c0_20 = arith.constant 0 : index
    %54 = vector.load %arg3[%c8_19, %c0_20] : memref<16x2xf32, #tpu.memory_space<vmem>>, vector<8x2xf32>
    tpu.vector_store %arg3[%c8_19, %c0_20], %53 {strides = array<i32>} : memref<16x2xf32, #tpu.memory_space<vmem>>, vector<8x2xf32>,
    return
  }
}

</mosaic_0001>

<bundles_post_ra>
// kernel: tpu_custom_call.1
= control target key start
LH: loop header
LB: loop body
LE: loop exit
PB: predicated region body
PF: predicated region fallthrough
CT: control target
= control target key end

     0   :  { %9 = vsyncpa [#allocation4], 0  ;;  %s572_s12 = smov [#allocation3]   ;;  %s673_s0 = inlined_call_operand.<no memory space> [shape: f32[1], index: 0, kind: input, shape index: {}]   ;;  %s674_s1 = inlined_call_operand.vmem [shape: f32[16,2], index: 1, kind: input, shape index: {}]   ;;  %s675_s2 = inlined_call_operand.hbm [shape: f32[416,128], index: 2, kind: input, shape index: {}]   ;;  %s676_s3 = inlined_call_operand.vmem [shape: f32[16,2], index: 3, kind: output, shape index: {}]  }
   0x1   :  { %s19_s13 = sshll.u32 %s572_s12, 4  ;;  %s20_s13 = int_to_ptr.vmem [resolvable:$true] %s19_s13 }
   0x2   :  { %s558_s14 = scalar_lea.vmem %s20_s13, 6656  ;;  %p563_p1 = scmp.lt.s32.totalorder %s20_s13, %s20_s13 }
   0x3   :  { %p559_p0 = scmp.ne.s32.totalorder %s20_s13, %s558_s14  ;;  %p564_p2 = scmp.lt.s32.totalorder %s558_s14, %s558_s14 }
   0x5   :  { %p565_p3 = por %p564_p2, %p563_p1 }
   0x7   :  { %p566_p4 = pnand %p565_p3, %p559_p0 }
   0x9   :  { %569 = shalt.err (!%p566_p4)
}
   0xa   :  { %s573_s15 = smov 128   ;;  %s574_s16 = smov 8  }
   0xb   :  { %25 = dma.hbm_to_vmem [thread:$0]  %s675_s2, 6656, %s20_s13, [#allocation4], %s573_s15, %s573_s15, %s574_s16  }
   0xc   :  { %570 = dma.done.wait [#allocation4], 6656  }
   0xd   :  { %571 = vsyncadd [#allocation4], 4294960640  ;;  %v575_v0 = vmov 1   ;;  %v576_v1 = vmov 0   ;;  %v577_v2 = vmov 0.0   ;;  %vm363_vm0 = vcmask 15360  }
   0xe   :  { %542 = vset.pattern.permute.xlu1 %v575_v0  ;;  %541 = vset.pattern.permute.xlu0 %v576_v1  ;;  %v29_v3 = vld [vmem:[%s674_s1] sm:$0xff]  ;;  %v30_v4 = vld [vmem:[%s674_s1 + $0x8] sm:$0xff]  ;;  %v102_v6 = vld [vmem:[#allocation3 + $0x78] sm:$0xff]  ;;  %vm578_vm1 = vmmov 0   ;;  %v48_v28 = vlaneseq  ;;  %v34_v30 = vstv %s673_s0 }
   0xf   :  { %429 = vmatprep.subr.mxu0 %v577_v2  ;;  %464 = vmatprep.subr.mxu1 %v577_v2  ;;  %v103_v5 = vld [vmem:[#allocation3 + $0x80] sm:$0xff]  ;;  %364 = vst.msk [vmem:[%s676_s3] sm:$0xff] %vm363_vm0, %v30_v4  ;;  %v101_v7 = vld [vmem:[#allocation3 + $0x70] sm:$0xff]  ;;  %v100_v8 = vld [vmem:[#allocation3 + $0x68] sm:$0xff] }
  0x10   :  { %67 = vperm.xlu1 %542, %v29_v3   ;;  %40 = vperm.xlu0 %541, %v29_v3   ;;  %v99_v9 = vld [vmem:[#allocation3 + $0x60] sm:$0xff]  ;;  %v98_v10 = vld [vmem:[#allocation3 + $0x58] sm:$0xff]  ;;  %v97_v11 = vld [vmem:[#allocation3 + $0x50] sm:$0xff]  ;;  %v49_v32 = vshrl.u32 %v48_v28, 7 }
  0x11   :  { %430 = vmatpush3.msra.mxu0 %v103_v5  ;;  %461 = vmatprep.mubr.msk.f32.mxu0 %vm578_vm1, %v577_v2  ;;  %v96_v12 = vld [vmem:[#allocation3 + $0x48] sm:$0xff]  ;;  %v95_v13 = vld [vmem:[#allocation3 + $0x40] sm:$0xff]  ;;  %v94_v14 = vld [vmem:[#allocation3 + $0x38] sm:$0xff] }
  0x12   :  { %431 = vmatprep.subr.mxu0 %v577_v2  ;;  %496 = vmatprep.mubr.msk.f32.mxu1 %vm578_vm1, %v577_v2  ;;  %v93_v15 = vld [vmem:[#allocation3 + $0x30] sm:$0xff]  ;;  %v92_v16 = vld [vmem:[#allocation3 + $0x28] sm:$0xff]  ;;  %v194_v18 = vld [vmem:[#allocation3 + $0x100] sm:$0xff]  ;;  %v50_v35 = vsub.s32 0, %v49_v32 }
  0x13   :  { %432 = vmatpush3.msra.mxu0 %v102_v6  ;;  %v195_v17 = vld [vmem:[#allocation3 + $0x108] sm:$0xff]  ;;  %v91_v19 = vld [vmem:[#allocation3 + $0x20] sm:$0xff]  ;;  %v193_v20 = vld [vmem:[#allocation3 + $0xf8] sm:$0xff] }
  0x14   :  { %78 = vperm.xlu1 %542, %v30_v4   ;;  %56 = vperm.xlu0 %541, %v30_v4   ;;  %v90_v21 = vld [vmem:[#allocation3 + $0x18] sm:$0xff]  ;;  %v192_v22 = vld [vmem:[#allocation3 + $0xf0] sm:$0xff]  ;;  %v191_v24 = vld [vmem:[#allocation3 + $0xe8] sm:$0xff] }
  0x15   :  { %433 = vmatprep.subr.mxu0 %v577_v2  ;;  %465 = vmatpush3.msra.mxu1 %v195_v17  ;;  %v89_v23 = vld [vmem:[#allocation3 + $0x10] sm:$0xff]  ;;  %v88_v25 = vld [vmem:[#allocation3 + $0x8] sm:$0xff]  ;;  %v190_v26 = vld [vmem:[#allocation3 + $0xe0] sm:$0xff] }
  0x16   :  { %434 = vmatpush3.msra.mxu0 %v101_v7  ;;  %466 = vmatprep.subr.mxu1 %v577_v2  ;;  %v189_v27 = vld [vmem:[#allocation3 + $0xd8] sm:$0xff]  ;;  %v33_v29 = vld [vmem:[#allocation3] sm:$0x1]  ;;  %v32_v33 = vld [vmem:[#allocation3 + $0x5] sm:$0x1] }
  0x17   :  { %435 = vmatprep.subr.mxu0 %v577_v2  ;;  %467 = vmatpush3.msra.mxu1 %v194_v18  ;;  %v35_v31 = vmul.f32 %v34_v30, %v33_v29  ;;  %v371_v36 = vld [vmem:[#allocation3 + $0x1] ss:$0 sm:$0xff]  ;;  %v372_v41 = vld [vmem:[#allocation3 + $0x3] ss:$0 sm:$0xff]  ;;  %v373_v42 = vld [vmem:[#allocation3 + $0x2] ss:$0 sm:$0xff] }
  0x18   :  { %436 = vmatpush3.msra.mxu0 %v100_v8  ;;  %543 = vset.pattern.permute.xlu0 %v575_v0  ;;  %v374_v46 = vld [vmem:[#allocation3 + $0x4] ss:$0 sm:$0xff]  ;;  %v188_v54 = vld [vmem:[#allocation3 + $0xd0] sm:$0xff]  ;;  %v187_v55 = vld [vmem:[#allocation3 + $0xc8] sm:$0xff] }
  0x19   :  { %437 = vmatprep.subr.mxu0 %v577_v2  ;;  %468 = vmatprep.subr.mxu1 %v577_v2  ;;  %v36_v34 = vadd.f32 %v35_v31, %v32_v33  ;;  %v186_v56 = vld [vmem:[#allocation3 + $0xc0] sm:$0xff]  ;;  %v185_v57 = vld [vmem:[#allocation3 + $0xb8] sm:$0xff]  ;;  %v184_v58 = vld [vmem:[#allocation3 + $0xb0] sm:$0xff] }
  0x1a   :  { %438 = vmatpush3.msra.mxu0 %v99_v9  ;;  %469 = vmatpush3.msra.mxu1 %v193_v20  ;;  %v183_v59 = vld [vmem:[#allocation3 + $0xa8] sm:$0xff]  ;;  %v182_v60 = vld [vmem:[#allocation3 + $0xa0] sm:$0xff]  ;;  %v181_v61 = vld [vmem:[#allocation3 + $0x98] sm:$0xff] }
  0x1b   :  { %439 = vmatprep.subr.mxu0 %v577_v2  ;;  %470 = vmatprep.subr.mxu1 %v577_v2  ;;  %v51_v39 = vrot.slane %v36_v34, %v50_v35  ;;  %v180_v62 = vld [vmem:[#allocation3 + $0x90] sm:$0xff]  ;;  %v286_v0 = vld [vmem:[#allocation3 + $0x188] sm:$0xff]  ;;  %v285_v1 = vld [vmem:[#allocation3 + $0x180] sm:$0xff] }
  0x1c   :  { %440 = vmatpush3.msra.mxu0 %v98_v10  ;;  %471 = vmatpush3.msra.mxu1 %v192_v22  ;;  %v287_v63 = vld [vmem:[#allocation3 + $0x190] sm:$0xff]  ;;  %v284_v3 = vld [vmem:[#allocation3 + $0x178] sm:$0xff]  ;;  %v282_v5 = vld [vmem:[#allocation3 + $0x168] sm:$0xff] }
  0x1d   :  { %441 = vmatprep.subr.mxu0 %v577_v2  ;;  %472 = vmatprep.subr.mxu1 %v577_v2  ;;  %v283_v4 = vld [vmem:[#allocation3 + $0x170] sm:$0xff]  ;;  %v281_v6 = vld [vmem:[#allocation3 + $0x160] sm:$0xff]  ;;  %v375_v7 = vld [vmem:[#allocation3 + $0x88] ss:$0 sm:$0xff] }
  0x1e   :  { %442 = vmatpush3.msra.mxu0 %v97_v11  ;;  %473 = vmatpush3.msra.mxu1 %v191_v24  ;;  %v275_v17 = vld [vmem:[#allocation3 + $0x130] sm:$0xff]  ;;  %v274_v18 = vld [vmem:[#allocation3 + $0x128] sm:$0xff]  ;;  %v272_v20 = vld [vmem:[#allocation3 + $0x118] sm:$0xff] }
  0x1f   :  { %443 = vmatprep.subr.mxu0 %v577_v2  ;;  %474 = vmatprep.subr.mxu1 %v577_v2 }
  0x20   :  { %444 = vmatpush3.msra.mxu0 %v96_v12  ;;  %475 = vmatpush3.msra.mxu1 %v190_v26  ;;  %v280_v12 = vld [vmem:[#allocation3 + $0x158] sm:$0xff] }
  0x21   :  { %445 = vmatprep.subr.mxu0 %v577_v2  ;;  %476 = vmatprep.subr.mxu1 %v577_v2  ;;  %v377_v26 = vld [vmem:[#allocation3 + $0x198] ss:$0 sm:$0xff] }
  0x22   :  { %446 = vmatpush3.msra.mxu0 %v95_v13  ;;  %477 = vmatpush3.msra.mxu1 %v189_v27  ;;  %v279_v13 = vld [vmem:[#allocation3 + $0x150] sm:$0xff] }
  0x23   :  { %447 = vmatprep.subr.mxu0 %v577_v2  ;;  %478 = vmatprep.subr.mxu1 %v577_v2 }
  0x24   :  { %448 = vmatpush3.msra.mxu0 %v94_v14  ;;  %479 = vmatpush3.msra.mxu1 %v188_v54  ;;  %v278_v14 = vld [vmem:[#allocation3 + $0x148] sm:$0xff] }
  0x25   :  { %449 = vmatprep.subr.mxu0 %v577_v2  ;;  %480 = vmatprep.subr.mxu1 %v577_v2 }
  0x26   :  { %450 = vmatpush3.msra.mxu0 %v93_v15  ;;  %481 = vmatpush3.msra.mxu1 %v187_v55  ;;  %v277_v15 = vld [vmem:[#allocation3 + $0x140] sm:$0xff] }
  0x27   :  { %451 = vmatprep.subr.mxu0 %v577_v2  ;;  %482 = vmatprep.subr.mxu1 %v577_v2 }
  0x28   :  { %452 = vmatpush3.msra.mxu0 %v92_v16  ;;  %483 = vmatpush3.msra.mxu1 %v186_v56  ;;  %v276_v16 = vld [vmem:[#allocation3 + $0x138] sm:$0xff] }
  0x29   :  { %453 = vmatprep.subr.mxu0 %v577_v2  ;;  %484 = vmatprep.subr.mxu1 %v577_v2 }
  0x2a   :  { %454 = vmatpush3.msra.mxu0 %v91_v19  ;;  %485 = vmatpush3.msra.mxu1 %v185_v57  ;;  %v273_v19 = vld [vmem:[#allocation3 + $0x120] sm:$0xff] }
  0x2b   :  { %455 = vmatprep.subr.mxu0 %v577_v2  ;;  %486 = vmatprep.subr.mxu1 %v577_v2 }
  0x2c   :  { %456 = vmatpush3.msra.mxu0 %v90_v21  ;;  %487 = vmatpush3.msra.mxu1 %v184_v58  ;;  %v376_v21 = vld [vmem:[#allocation3 + $0x110] ss:$0 sm:$0xff] }
  0x2d   :  { %457 = vmatprep.subr.mxu0 %v577_v2  ;;  %488 = vmatprep.subr.mxu1 %v577_v2 }
  0x2e   :  { %458 = vmatpush3.msra.mxu0 %v89_v23  ;;  %489 = vmatpush3.msra.mxu1 %v183_v59 }
  0x2f   :  { %459 = vmatprep.subr.mxu0 %v577_v2  ;;  %490 = vmatprep.subr.mxu1 %v577_v2 }
  0x30   :  { %460 = vmatpush3.msra.mxu0 %v88_v25  ;;  %491 = vmatpush3.msra.mxu1 %v182_v60 }
  0x31   :  { %499 = vmatprep.subr.mxu0 %v577_v2  ;;  %492 = vmatprep.subr.mxu1 %v577_v2 }
  0x32   :  { %493 = vmatpush3.msra.mxu1 %v181_v61 }
  0x33   :  { %494 = vmatprep.subr.mxu1 %v577_v2 }
  0x34   :  { %495 = vmatpush3.msra.mxu1 %v180_v62 }
  0x8b   :  { %v68_v37 = vpop.permute.xlu1 %67  ;;  %v41_v38 = vpop.permute.xlu0 %40 }
  0x8c   :  { %v47_v40 = vmul.f32 %v371_v36, %v41_v38  ;;  %v74_v48 = vmul.f32 %v373_v42, %v68_v37 }
  0x8e   :  { %v52_v44 = vadd.f32 %v51_v39, %v47_v40 }
  0x8f   :  { %v57_v43 = vpop.permute.xlu0 %56  ;;  %v79_v47 = vpop.permute.xlu1 %78 }
  0x90   :  { %v63_v45 = vmul.f32 %v372_v41, %v57_v43  ;;  %v85_v50 = vmul.f32 %v374_v46, %v79_v47 }
  0x92   :  { %v64_v49 = vadd.f32 %v63_v45, %v52_v44 }
  0x94   :  { %v75_v51 = vadd.f32 %v74_v48, %v64_v49 }
  0x96   :  { %v86_v52 = vadd.f32 %v85_v50, %v75_v51 }
  0x98   :  { %544 = vtanh.f32 %v86_v52 }
  0xa5   :  { %v545_v53 = vpop.eup %544 }
  0xa6   :  { %462 = vmatmul.mubr.f32.vlgmr.msra.gmra.mxu0 %v545_v53 }
  0xa7   :  { %531 = vmatprep.mubr.msk.f32.mxu0 %vm578_vm1, %v577_v2  ;;  %500 = vmatpush3.msra.mxu0 %v287_v63 }
  0xa8   :  { %501 = vmatprep.subr.mxu0 %v577_v2 }
  0xa9   :  { %502 = vmatpush3.msra.mxu0 %v286_v0 }
  0xaa   :  { %503 = vmatprep.subr.mxu0 %v577_v2 }
  0xab   :  { %504 = vmatpush3.msra.mxu0 %v285_v1 }
  0xac   :  { %505 = vmatprep.subr.mxu0 %v577_v2 }
  0xad   :  { %506 = vmatpush3.msra.mxu0 %v284_v3 }
  0xae   :  { %507 = vmatprep.subr.mxu0 %v577_v2 }
  0xaf   :  { %508 = vmatpush3.msra.mxu0 %v283_v4 }
  0xb0   :  { %509 = vmatprep.subr.mxu0 %v577_v2 }
  0xb1   :  { %510 = vmatpush3.msra.mxu0 %v282_v5 }
  0xb2   :  { %511 = vmatprep.subr.mxu0 %v577_v2 }
  0xb3   :  { %512 = vmatpush3.msra.mxu0 %v281_v6 }
  0xb4   :  { %513 = vmatprep.subr.mxu0 %v577_v2 }
  0xb5   :  { %514 = vmatpush3.msra.mxu0 %v280_v12 }
  0xb6   :  { %515 = vmatprep.subr.mxu0 %v577_v2 }
  0xb7   :  { %516 = vmatpush3.msra.mxu0 %v279_v13 }
  0xb8   :  { %517 = vmatprep.subr.mxu0 %v577_v2 }
  0xb9   :  { %518 = vmatpush3.msra.mxu0 %v278_v14 }
  0xba   :  { %519 = vmatprep.subr.mxu0 %v577_v2 }
  0xbb   :  { %520 = vmatpush3.msra.mxu0 %v277_v15 }
  0xbc   :  { %521 = vmatprep.subr.mxu0 %v577_v2 }
  0xbd   :  { %522 = vmatpush3.msra.mxu0 %v276_v16 }
  0xbe   :  { %523 = vmatprep.subr.mxu0 %v577_v2 }
  0xbf   :  { %524 = vmatpush3.msra.mxu0 %v275_v17 }
  0xc0   :  { %525 = vmatprep.subr.mxu0 %v577_v2 }
  0xc1   :  { %526 = vmatpush3.msra.mxu0 %v274_v18 }
  0xc2   :  { %527 = vmatprep.subr.mxu0 %v577_v2 }
  0xc3   :  { %528 = vmatpush3.msra.mxu0 %v273_v19 }
  0xc4   :  { %529 = vmatprep.subr.mxu0 %v577_v2 }
  0xc5   :  { %530 = vmatpush3.msra.mxu0 %v272_v20 }
 0x166   :  { %v175_v8 = vpop.f32.mrf.mxu0 }
 0x167   :  { %v176_v9 = vadd.f32 %v375_v7, %v175_v8 }
 0x168   :  { %v463_v10 = vpop.f32.mrf.mxu0 }
 0x169   :  { %546 = vtanh.f32 %v176_v9 }
 0x176   :  { %v547_v11 = vpop.eup %546 }
 0x177   :  { %497 = vmatmul.mubr.f32.vlgmr.msra.gmra.mxu1 %v547_v11 }
 0x237   :  { %v267_v22 = vpop.f32.mrf.mxu1 }
 0x238   :  { %v268_v23 = vadd.f32 %v376_v21, %v267_v22 }
 0x239   :  { %v498_v24 = vpop.f32.mrf.mxu1 }
 0x23a   :  { %548 = vtanh.f32 %v268_v23 }
 0x247   :  { %v549_v25 = vpop.eup %548 }
 0x248   :  { %532 = vmatmul.mubr.f32.vlgmr.msra.gmra.mxu0 %v549_v25 }
 0x308   :  { %v359_v27 = vpop.f32.mrf.mxu0 }
 0x309   :  { %v360_v28 = vadd.f32 %v377_v26, %v359_v27 }
 0x30a   :  { %v533_v29 = vpop.f32.mrf.mxu0 }
 0x30b   :  { %365 = vst.msk [vmem:[%s676_s3 + $0x8] sm:$0xff] %vm363_vm0, %v360_v28 }
 0x30c   :  { %370 = vsyncpa [#allocation4], 1 }

</bundles_post_ra>
